<compile_context>
chip_gen: v5e
topology: v5e:2x2
jax: 0.10.0
libtpu: 0.0.40
codegen_flags: <defaults>
</compile_context>

<pallas_src>
import functools

import jax
import jax.numpy as jnp
from jax.experimental import pallas as pl
from jax.experimental.pallas import tpu as pltpu

_LANE = 128
_VMEM_CAP_BYTES = 44 << 20  # conservative per-core budget (v7x has 64 MiB physical VMEM)


def _round_up(x, m):
    return ((x + m - 1) // m) * m


def _padded_bytes(rows, cols, itemsize):
    """Bytes of a VMEM-resident 2-D buffer after (sublane, lane) tile padding."""
    sub = 16 if itemsize == 2 else 8  # sub-32-bit dtypes pack along sublanes
    return _round_up(max(rows, 1), sub) * _round_up(max(cols, 1), _LANE) * itemsize


def _estimate_vmem_bytes(tb, in_dim, hid, out_dim):
    # Resident operands: folded weights (bf16 for blocks 1-2, worst-case f32 for block 3)
    # plus the three per-feature shifts (f32).
    resident = (_padded_bytes(in_dim, hid, 2) + _padded_bytes(hid, hid, 2)
                + _padded_bytes(hid, out_dim, 4)
                + 2 * _padded_bytes(1, hid, 4) + _padded_bytes(1, out_dim, 4))
    # Streamed per batch tile: x (double-buffered), out (double-buffered), two f32
    # intermediates, bf16 casts -> budget ~8 lane-padded f32-equivalent live buffers.
    streamed = 8 * _round_up(tb, 8) * _LANE * 4
    return resident + streamed


def _choose_batch_tile(B, max_tile_rows=4096):
    """Batch tile: multiple of 8, ~2 MiB lane-padded streamed buffers at the cap, and small
    enough that there are >= 2 (ideally an even number of) grid steps for v7x megacore."""
    tb = min(max_tile_rows, _round_up(B, 8))
    if B >= 16:  # keep at least 2 grid steps so "parallel" can shard across both TensorCores
        tb = min(tb, _round_up(pl.cdiv(B, 2), 8))
    n = pl.cdiv(B, tb)
    if n > 1 and n % 2 == 1:
        n += 1
    return _round_up(pl.cdiv(B, n), 8)


def _static_generator_kernel(x_ref,
                             w1_ref, c1_ref,
                             w2_ref, c2_ref,
                             w3_ref, c3_ref,
                             o_ref, *, categorical: bool):
    """Fused 3-block MLP on one batch tile; folded weights stay VMEM-resident."""
    x = x_ref[...]

    # Block 1: Linear(+folded BN) + ReLU (Dropout == identity in eval). bf16 MXU, f32 epilogue.
    h = jnp.dot(x.astype(w1_ref.dtype), w1_ref[...], preferred_element_type=jnp.float32)
    h = jnp.maximum(h + c1_ref[...], 0.0)

    # Block 2
    h = jnp.dot(h.astype(w2_ref.dtype), w2_ref[...], preferred_element_type=jnp.float32)
    h = jnp.maximum(h + c2_ref[...], 0.0)

    # Block 3 (f32 weights when categorical so rounding near x.5 stays faithful; bf16 otherwise)
    y = jnp.dot(h.astype(w3_ref.dtype), w3_ref[...], preferred_element_type=jnp.float32)
    y = jnp.maximum(y + c3_ref[...], 0.0)
    # NOTE: folding the +c adds into the matmul (extra K row) only pays if the VALU slot binds;
    # left as separate broadcast-adds (hidden under MXU/DMA at these shapes).

    if categorical:
        y = jnp.round(y)  # torch.round: round-half-to-even, same as jnp.round

    o_ref[...] = y.astype(o_ref.dtype)


def static_generator_forward(x, folded, data_type="categorical", max_tile_rows=4096):
    """folded: dict with w{i} (in,out) BN-folded weights and c{i} (1,out) f32 shifts, i=1..3."""
    B, in_dim = x.shape
    hid = folded["w1"].shape[1]
    out_dim = folded["w3"].shape[1]

    tb = _choose_batch_tile(B, max_tile_rows)
    need = _estimate_vmem_bytes(tb, in_dim, hid, out_dim)
    while need > _VMEM_CAP_BYTES and tb > 8:
        tb = max(8, _round_up(tb // 2, 8))
        need = _estimate_vmem_bytes(tb, in_dim, hid, out_dim)
    if need > _VMEM_CAP_BYTES:
        # TODO(synk): fall back to tiling the hidden/output feature axes with an extra
        # "arbitrary" grid dimension when the folded weights alone exceed per-core VMEM.
        raise ValueError("Folded weights do not fit the per-core VMEM budget.")
    n_blocks = pl.cdiv(B, tb)
    vmem_limit = int(min(max(need + (4 << 20), 16 << 20), 64 << 20))

    kernel = functools.partial(_static_generator_kernel,
                               categorical=(data_type == "categorical"))

    const = lambda i: (0, 0)  # resident operands: same block every grid step -> no re-DMA
    grid_spec = pltpu.PrefetchScalarGridSpec(
        num_scalar_prefetch=0,
        grid=(n_blocks,),
        in_specs=[
            # x streamed per batch tile (double-buffered by the BlockSpec pipeline).
            # TODO(synk): bump to pipeline_mode=pl.Buffered(3) only if a trace shows exposed DMA.
            pl.BlockSpec((tb, in_dim), lambda i: (i, 0)),
            pl.BlockSpec((in_dim, hid), const),
            pl.BlockSpec((1, hid), const),
            pl.BlockSpec((hid, hid), const),
            pl.BlockSpec((1, hid), const),
            pl.BlockSpec((hid, out_dim), const),
            pl.BlockSpec((1, out_dim), const),
        ],
        out_specs=pl.BlockSpec((tb, out_dim), lambda i: (i, 0)),
    )

    weight_bytes = sum(int(folded[k].size) * folded[k].dtype.itemsize for k in folded)
    cost = pl.CostEstimate(
        flops=2 * B * (in_dim * hid + hid * hid + hid * out_dim),
        transcendentals=0,
        bytes_accessed=4 * B * (in_dim + out_dim) + weight_bytes)

    # Pallas handles the partial last batch block (OOB reads undefined, OOB writes dropped),
    # so ragged B needs no wrapper-side pad/slice HBM passes.
    return pl.pallas_call(
        kernel,
        out_shape=jax.ShapeDtypeStruct((B, out_dim), jnp.float32),
        grid_spec=grid_spec,
        cost_estimate=cost,
        compiler_params=pltpu.CompilerParams(
            dimension_semantics=("parallel",),  # v7x: shard batch tiles across the 2 TCs
            vmem_limit_bytes=vmem_limit),
    )(x,
      folded["w1"], folded["c1"],
      folded["w2"], folded["c2"],
      folded["w3"], folded["c3"])


def make_raw_params(key, input_dim, hidden_dim, output_dim, eps=1e-5):
    """Deterministic synthetic parameters matching the PyTorch module's shapes (un-folded)."""
    dims = [(input_dim, hidden_dim), (hidden_dim, hidden_dim), (hidden_dim, output_dim)]
    raw = {"eps": eps}
    for i, (din, dout) in enumerate(dims, start=1):
        key, kw, kb, kg, kbeta, km, kv = jax.random.split(key, 7)
        raw[f"w{i}"] = jax.random.normal(kw, (dout, din), jnp.float32) / jnp.sqrt(din)
        raw[f"b{i}"] = 0.1 * jax.random.normal(kb, (dout,), jnp.float32)
        raw[f"gamma{i}"] = 1.0 + 0.1 * jax.random.normal(kg, (dout,), jnp.float32)
        raw[f"beta{i}"] = 0.1 * jax.random.normal(kbeta, (dout,), jnp.float32)
        raw[f"mean{i}"] = 0.1 * jax.random.normal(km, (dout,), jnp.float32)
        raw[f"var{i}"] = 1.0 + 0.1 * jax.random.uniform(kv, (dout,), jnp.float32)
    return raw


def fold_params(raw, data_type="categorical", matmul_dtype=jnp.bfloat16):
    """Fold eval-mode BN into the Linear weights (cast once to the MXU dtype) + one f32 shift."""
    eps = raw["eps"]
    folded = {}
    for i in (1, 2, 3):
        s = raw[f"gamma{i}"] / jnp.sqrt(raw[f"var{i}"] + eps)
        t = raw[f"beta{i}"] - raw[f"mean{i}"] * s
        w = jnp.transpose(raw[f"w{i}"]) * s[None, :]           # (din, dout), BN scale folded
        dt = jnp.float32 if (i == 3 and data_type == "categorical") else matmul_dtype
        folded[f"w{i}"] = w.astype(dt)
        folded[f"c{i}"] = (raw[f"b{i}"] * s + t).reshape(1, -1).astype(jnp.float32)
    return folded


def folded_reference(x, folded, data_type="numerical"):
    """Plain-JAX reference that mirrors the kernel's folded weights and matmul dtypes exactly."""
    h = x
    for i in (1, 2, 3):
        w, c = folded[f"w{i}"], folded[f"c{i}"]
        h = jnp.dot(h.astype(w.dtype), w, preferred_element_type=jnp.float32) + c
        h = jnp.maximum(h, 0.0)
    return jnp.round(h) if data_type == "categorical" else h


def reference_forward(x, raw, data_type="categorical"):
    """Full-f32, un-folded eval-mode reference of the PyTorch forward (sanity check)."""
    eps = raw["eps"]
    h = x
    for i in (1, 2, 3):
        h = h @ raw[f"w{i}"].T + raw[f"b{i}"]
        h = (h - raw[f"mean{i}"]) / jnp.sqrt(raw[f"var{i}"] + eps) * raw[f"gamma{i}"] \
            + raw[f"beta{i}"]
        h = jnp.maximum(h, 0.0)
    return jnp.round(h) if data_type == "categorical" else h


if __name__ == "__main__":
    key = jax.random.PRNGKey(0)
    kx1, kx2, kp = jax.random.split(key, 3)

    input_dim, hidden_dim, output_dim = 16, 32, 8
    raw = make_raw_params(kp, input_dim, hidden_dim, output_dim)
    folded_cat = fold_params(raw, "categorical")   # bf16 w1/w2, f32 w3 (protects rounding)
    folded_num = fold_params(raw, "numerical")     # bf16 w1/w2/w3

    # Case 1: categorical, B=64 (splits into 2 even batch tiles -> megacore-shardable grid).
    x1 = jax.random.normal(kx1, (64, input_dim), jnp.float32)
    out_cat = jax.block_until_ready(static_generator_forward(x1, folded_cat, "categorical"))
    pre_cat = jax.block_until_ready(static_generator_forward(x1, folded_cat, "numerical"))
    assert out_cat.shape == (64, output_dim)
    # Rounding is the only difference between the two calls (identical folded params).
    assert jnp.array_equal(out_cat, jnp.round(pre_cat)), "categorical rounding mismatch"
    # Kernel matches a plain-JAX reference mirroring the bf16 matmul precision...
    assert jnp.allclose(pre_cat, folded_reference(x1, folded_cat), atol=1e-3, rtol=1e-3), \
        "mismatch vs precision-mirrored reference (categorical params)"
    # ...and the full-f32 un-folded reference to bf16 tolerance.
    assert jnp.allclose(pre_cat, reference_forward(x1, raw, "numerical"),
                        atol=5e-2, rtol=5e-2), "mismatch vs f32 reference"

    # Case 2: numerical, ragged B=37 (exercises the partial last batch block, no pad/slice).
    x2 = jax.random.normal(kx2, (37, input_dim), jnp.float32)
    out_num = jax.block_until_ready(static_generator_forward(x2, folded_num, "numerical"))
    assert out_num.shape == (37, output_dim)
    assert jnp.allclose(out_num, folded_reference(x2, folded_num), atol=1e-3, rtol=1e-3), \
        "mismatch vs precision-mirrored reference (numerical params)"
    assert jnp.allclose(out_num, reference_forward(x2, raw, "numerical"),
                        atol=5e-2, rtol=5e-2), "mismatch vs f32 reference (ragged batch)"

    print("KERNEL_OK")
</pallas_src>

<mosaic_0001>
module attributes {stable_mosaic.version = 11 : i64} {
  func.func @_static_generator_kernel(%arg0: i32, %arg1: memref<32x16xf32, #tpu.memory_space<vmem>>, %arg2: memref<16x32xbf16, #tpu.memory_space<vmem>>, %arg3: memref<1x32xf32, #tpu.memory_space<vmem>>, %arg4: memref<32x32xbf16, #tpu.memory_space<vmem>>, %arg5: memref<1x32xf32, #tpu.memory_space<vmem>>, %arg6: memref<32x8xf32, #tpu.memory_space<vmem>>, %arg7: memref<1x8xf32, #tpu.memory_space<vmem>>, %arg8: memref<32x8xf32, #tpu.memory_space<vmem>>) attributes {dimension_semantics = [#tpu.dimension_semantics<parallel>], iteration_bounds = array<i64: 2>, scalar_prefetch = 0 : i64, scratch_operands = 0 : i64, tpu.core_type = #tpu.core_type<tc>, window_params = [{transform_indices = @transform_0, window_bounds = array<i64: 32, 16>}, {pipeline_mode = #tpu.pipeline_mode<synchronous>, transform_indices = @transform_1, window_bounds = array<i64: 16, 32>}, {pipeline_mode = #tpu.pipeline_mode<synchronous>, transform_indices = @transform_2, window_bounds = array<i64: 1, 32>}, {pipeline_mode = #tpu.pipeline_mode<synchronous>, transform_indices = @transform_3, window_bounds = array<i64: 32, 32>}, {pipeline_mode = #tpu.pipeline_mode<synchronous>, transform_indices = @transform_4, window_bounds = array<i64: 1, 32>}, {pipeline_mode = #tpu.pipeline_mode<synchronous>, transform_indices = @transform_5, window_bounds = array<i64: 32, 8>}, {pipeline_mode = #tpu.pipeline_mode<synchronous>, transform_indices = @transform_6, window_bounds = array<i64: 1, 8>}, {transform_indices = @transform_7, window_bounds = array<i64: 32, 8>}]} {
    %c0 = arith.constant 0 : index
    %c0_0 = arith.constant 0 : index
    %0 = vector.load %arg1[%c0, %c0_0] : memref<32x16xf32, #tpu.memory_space<vmem>>, vector<32x16xf32>
    %1 = arith.truncf %0 : vector<32x16xf32> to vector<32x16xbf16>
    %c0_1 = arith.constant 0 : index
    %c0_2 = arith.constant 0 : index
    %2 = vector.load %arg2[%c0_1, %c0_2] : memref<16x32xbf16, #tpu.memory_space<vmem>>, vector<16x32xbf16>
    %cst = arith.constant dense<0.000000e+00> : vector<32x32xf32>
    %3 = tpu.matmul %1, %2, %cst {dimension_numbers = #tpu.dot_dimension_numbers<[1], [0], [0], [1], [0, 0, 1, 1], [], []>} : vector<32x16xbf16>, vector<16x32xbf16>, vector<32x32xf32> -> vector<32x32xf32>
    %c0_3 = arith.constant 0 : index
    %c0_4 = arith.constant 0 : index
    %4 = vector.load %arg3[%c0_3, %c0_4] : memref<1x32xf32, #tpu.memory_space<vmem>>, vector<1x32xf32>
    %5 = vector.broadcast %4 : vector<1x32xf32> to vector<32x32xf32>
    %6 = arith.addf %3, %5 : vector<32x32xf32>
    %cst_5 = arith.constant 0.000000e+00 : f32
    %7 = vector.broadcast %cst_5 : f32 to vector<32x32xf32>
    %8 = arith.maximumf %6, %7 : vector<32x32xf32>
    %9 = arith.truncf %8 : vector<32x32xf32> to vector<32x32xbf16>
    %c0_6 = arith.constant 0 : index
    %c0_7 = arith.constant 0 : index
    %10 = vector.load %arg4[%c0_6, %c0_7] : memref<32x32xbf16, #tpu.memory_space<vmem>>, vector<32x32xbf16>
    %cst_8 = arith.constant dense<0.000000e+00> : vector<32x32xf32>
    %11 = tpu.matmul %9, %10, %cst_8 {dimension_numbers = #tpu.dot_dimension_numbers<[1], [0], [0], [1], [0, 0, 1, 1], [], []>} : vector<32x32xbf16>, vector<32x32xbf16>, vector<32x32xf32> -> vector<32x32xf32>
    %c0_9 = arith.constant 0 : index
    %c0_10 = arith.constant 0 : index
    %12 = vector.load %arg5[%c0_9, %c0_10] : memref<1x32xf32, #tpu.memory_space<vmem>>, vector<1x32xf32>
    %13 = vector.broadcast %12 : vector<1x32xf32> to vector<32x32xf32>
    %14 = arith.addf %11, %13 : vector<32x32xf32>
    %cst_11 = arith.constant 0.000000e+00 : f32
    %15 = vector.broadcast %cst_11 : f32 to vector<32x32xf32>
    %16 = arith.maximumf %14, %15 : vector<32x32xf32>
    %c0_12 = arith.constant 0 : index
    %c0_13 = arith.constant 0 : index
    %17 = vector.load %arg6[%c0_12, %c0_13] : memref<32x8xf32, #tpu.memory_space<vmem>>, vector<32x8xf32>
    %cst_14 = arith.constant dense<0.000000e+00> : vector<32x8xf32>
    %18 = tpu.matmul %16, %17, %cst_14 {dimension_numbers = #tpu.dot_dimension_numbers<[1], [0], [0], [1], [0, 0, 1, 1], [], []>} : vector<32x32xf32>, vector<32x8xf32>, vector<32x8xf32> -> vector<32x8xf32>
    %c0_15 = arith.constant 0 : index
    %c0_16 = arith.constant 0 : index
    %19 = vector.load %arg7[%c0_15, %c0_16] : memref<1x8xf32, #tpu.memory_space<vmem>>, vector<1x8xf32>
    %20 = vector.broadcast %19 : vector<1x8xf32> to vector<32x8xf32>
    %21 = arith.addf %18, %20 : vector<32x8xf32>
    %cst_17 = arith.constant 0.000000e+00 : f32
    %22 = vector.broadcast %cst_17 : f32 to vector<32x8xf32>
    %23 = arith.maximumf %21, %22 : vector<32x8xf32>
    %24 = math.roundeven %23 : vector<32x8xf32>
    %c0_18 = arith.constant 0 : index
    %c0_19 = arith.constant 0 : index
    %25 = vector.load %arg8[%c0_18, %c0_19] : memref<32x8xf32, #tpu.memory_space<vmem>>, vector<32x8xf32>
    tpu.vector_store %arg8[%c0_18, %c0_19], %24 {strides = array<i32>} : memref<32x8xf32, #tpu.memory_space<vmem>>, vector<32x8xf32>,
    return
  }
  func.func @transform_0(%arg0: i32) -> (i32, i32) {
    %c0_i32 = arith.constant 0 : i32
    %c0_i32_0 = arith.constant 0 : i32
    return %arg0, %c0_i32 : i32, i32
  }
  func.func @transform_1(%arg0: i32) -> (i32, i32) {
    %c0_i32 = arith.constant 0 : i32
    %c0_i32_0 = arith.constant 0 : i32
    %c0_i32_1 = arith.constant 0 : i32
    return %c0_i32, %c0_i32_0 : i32, i32
  }
  func.func @transform_2(%arg0: i32) -> (i32, i32) {
    %c0_i32 = arith.constant 0 : i32
    %c0_i32_0 = arith.constant 0 : i32
    %c0_i32_1 = arith.constant 0 : i32
    return %c0_i32, %c0_i32_0 : i32, i32
  }
  func.func @transform_3(%arg0: i32) -> (i32, i32) {
    %c0_i32 = arith.constant 0 : i32
    %c0_i32_0 = arith.constant 0 : i32
    %c0_i32_1 = arith.constant 0 : i32
    return %c0_i32, %c0_i32_0 : i32, i32
  }
  func.func @transform_4(%arg0: i32) -> (i32, i32) {
    %c0_i32 = arith.constant 0 : i32
    %c0_i32_0 = arith.constant 0 : i32
    %c0_i32_1 = arith.constant 0 : i32
    return %c0_i32, %c0_i32_0 : i32, i32
  }
  func.func @transform_5(%arg0: i32) -> (i32, i32) {
    %c0_i32 = arith.constant 0 : i32
    %c0_i32_0 = arith.constant 0 : i32
    %c0_i32_1 = arith.constant 0 : i32
    return %c0_i32, %c0_i32_0 : i32, i32
  }
  func.func @transform_6(%arg0: i32) -> (i32, i32) {
    %c0_i32 = arith.constant 0 : i32
    %c0_i32_0 = arith.constant 0 : i32
    %c0_i32_1 = arith.constant 0 : i32
    return %c0_i32, %c0_i32_0 : i32, i32
  }
  func.func @transform_7(%arg0: i32) -> (i32, i32) {
    %c0_i32 = arith.constant 0 : i32
    %c0_i32_0 = arith.constant 0 : i32
    return %arg0, %c0_i32 : i32, i32
  }
}

</mosaic_0001>

<bundles_post_ra>
// kernel: tpu_custom_call.1
= control target key start
LH: loop header
LB: loop body
LE: loop exit
PB: predicated region body
PF: predicated region fallthrough
CT: control target
= control target key end

     0   :  { %s632_s24 = smov 0   ;;  %s702_s0 = inlined_call_operand.vmem [shape: f32[64,16], index: 0, kind: input, shape index: {}]   ;;  %s703_s1 = inlined_call_operand.vmem [shape: bf16[16,32], index: 1, kind: input, shape index: {}]   ;;  %s704_s2 = inlined_call_operand.vmem [shape: f32[1,32], index: 2, kind: input, shape index: {}]   ;;  %s705_s3 = inlined_call_operand.vmem [shape: bf16[32,32], index: 3, kind: input, shape index: {}]   ;;  %s706_s4 = inlined_call_operand.vmem [shape: f32[1,32], index: 4, kind: input, shape index: {}]   ;;  %s707_s5 = inlined_call_operand.vmem [shape: f32[32,8], index: 5, kind: input, shape index: {}]   ;;  %s708_s6 = inlined_call_operand.vmem [shape: f32[1,8], index: 6, kind: input, shape index: {}]   ;;  %s709_s7 = inlined_call_operand.vmem [shape: f32[64,8], index: 7, kind: output, shape index: {}]  }
   0x1 LB: > { %s501_s25 = sadd.s32 4294967295, %s590_s24   ;;  %p505_p0 = scmp.ge.s32.totalorder %s590_s24, 1  ;;  %s590_s24 = sphi %s632_s24, %s17_s24  }
   0x2   : > { %p238_p1 = scmp.lt.s32.totalorder %s590_s24, 3 }
   0x4   : > { %p239_p2 = pnand %p505_p0, %p238_p1 }
   0x5   : > { %s506_s28 = sshll.u32 (!%p239_p2), %s501_s25, 2 }
   0x6   : > { %242 = sbr.rel (%p239_p2) target bundleno = 463 (0x1cf), region = 48  ;;  %p271_p3 = scmp.lt.s32.totalorder (!%p239_p2), %s506_s28, 7 }
   0xb   : > { %v532_v0 = vld [vmem:[%s703_s1] sm:$0xff]  ;;  %s711_s28 = smov (!%p271_p3, %s506_s28), 7  ;;  %vm301_vm0 = vcmask 130048   ;;  %v534_v7 = vld [vmem:[%s705_s3 + $0x8] sm:$0xff]  ;;  %v386_v9 = vld [vmem:[%s707_s5 + $0x18] sm:$0xff]  ;;  %vm353_vm1 = vcmask 261120  }
   0xc   : > { %315 = vmatpush.bf16.msra.mxu0 %v532_v0  ;;  %s507_s29 = sshll.u32 %s711_s28, 3  ;;  %366 = vmatpush.bf16.msra.mxu1 %v534_v7  ;;  %v533_v8 = vld [vmem:[%s705_s3] sm:$0xff]  ;;  %v385_v25 = vld [vmem:[%s707_s5 + $0x10] sm:$0xff]  ;;  %v384_v26 = vld [vmem:[%s707_s5 + $0x8] sm:$0xff]  ;;  %vm440_vm2 = vcmask 64512  }
   0xd   : > { %s274_s9 = scalar_lea.vmem %s702_s0, %s507_s29  ;;  %535 = vmatpush.bf16.msra.mxu3 %v534_v7  ;;  %537 = vmatpush.msra.mxu2 %v386_v9  ;;  %v581_v11 = vld [vmem:[%s704_s2] ss:$0 sm:$0xff]  ;;  %s689_s10 = scalar_lea.vmem %s709_s7, %s507_s29 }
   0xe   : > { %v283_v1 = vld [vmem:[%s274_s9] sm:$0xff]  ;;  %v284_v2 = vld [vmem:[%s274_s9 + $0x8] sm:$0xff]  ;;  %v285_v4 = vld [vmem:[%s274_s9 + $0x10] sm:$0xff] }
   0xf   : > { %v287_v3 = vpack.c.bf16 %v284_v2, %v283_v1  ;;  %v286_v5 = vld [vmem:[%s274_s9 + $0x18] sm:$0xff]  ;;  %538 = vmatpush.msra.mxu2 %v385_v25  ;;  %v383_v27 = vld [vmem:[%s707_s5] sm:$0xff] }
  0x10   : > { %v288_v6 = vpack.c.bf16 %v286_v5, %v285_v4  ;;  %367 = vmatpush.bf16.msra.mxu1 %v533_v8  ;;  %v582_v28 = vld [vmem:[%s706_s4] ss:$0 sm:$0xff] }
  0x11   : > { %514 = vmatmul.msk.bf16.vlgmr.msra.gmra.mxu0 %vm301_vm0, %v287_v3  ;;  %536 = vmatpush.bf16.msra.mxu3 %v533_v8  ;;  %v583_v41 = vld [vmem:[%s708_s6] ss:$0 sm:$0xff] }
  0x12   : > { %539 = vmatpush.msra.mxu2 %v384_v26 }
  0x14   : > { %415 = vmatpush.msrb.mxu1 %v386_v9  ;;  %540 = vmatpush.msra.mxu2 %v383_v27 }
  0x16   : > { %416 = vmatpush.msrb.mxu1 %v385_v25 }
  0x18   : > { %417 = vmatpush.msrb.mxu1 %v384_v26 }
  0x1a   : > { %418 = vmatpush.msrb.mxu1 %v383_v27 }
  0x21   : > { %515 = vmatmul.msk.bf16.gmra.mxu0 %vm301_vm0, %v288_v6 }
  0x8e   : > { %v317_v10 = vpop.f32.mrf.mxu0 }
  0x8f   : > { %v318_v12 = vadd.f32 %v581_v11, %v317_v10 }
  0x91   : > { %v327_v15 = vmax.f32 %v318_v12, 0.0 }
  0x96   : > { %v319_v13 = vpop.f32.mrf.mxu0 }
  0x97   : > { %v320_v14 = vadd.f32 %v581_v11, %v319_v13 }
  0x99   : > { %v328_v16 = vmax.f32 %v320_v14, 0.0 }
  0x9b   : > { %v331_v17 = vpack.c.bf16 %v328_v16, %v327_v15 }
  0x9d   : > { %524 = vmatmul.msk.bf16.vlgmr.msra.gmra.mxu1 %vm353_vm1, %v331_v17 }
  0x9e   : > { %v322_v18 = vpop.f32.mrf.mxu0 }
  0x9f   : > { %v323_v19 = vadd.f32 %v581_v11, %v322_v18 }
  0xa1   : > { %v329_v22 = vmax.f32 %v323_v19, 0.0 }
  0xa6   : > { %v324_v20 = vpop.f32.mrf.mxu0 }
  0xa7   : > { %v325_v21 = vadd.f32 %v581_v11, %v324_v20 }
  0xa9   : > { %v330_v23 = vmax.f32 %v325_v21, 0.0 }
  0xab   : > { %v332_v24 = vpack.c.bf16 %v330_v23, %v329_v22 }
  0xad   : > { %525 = vmatmul.msk.bf16.vlgmr.msra.gmra.mxu3 %vm353_vm1, %v332_v24 }
 0x11a   : > { %v369_v29 = vpop.f32.mrf.mxu1 }
 0x11b   : > { %v370_v30 = vadd.f32 %v582_v28, %v369_v29 }
 0x11d   : > { %v379_v31 = vmax.f32 %v370_v30, 0.0 }
 0x11f   : > { %526 = vmatmul.msk.f32.vlgmr.msrb.gmra.mxu1 %vm353_vm1, %v379_v31 }
 0x122   : > { %v371_v32 = vpop.f32.mrf.mxu1 }
 0x123   : > { %v372_v33 = vadd.f32 %v582_v28, %v371_v32 }
 0x125   : > { %v380_v34 = vmax.f32 %v372_v33, 0.0 }
 0x127   : > { %527 = vmatmul.msk.f32.vlgmr.msra.gmra.mxu2 %vm353_vm1, %v380_v34 }
 0x130   : > { %v374_v35 = vpop.f32.mrf.mxu3 }
 0x131   : > { %v375_v36 = vadd.f32 %v582_v28, %v374_v35 }
 0x133   : > { %v381_v37 = vmax.f32 %v375_v36, 0.0 }
 0x135   : > { %528 = vmatmul.msk.f32.gmra.mxu2 %vm353_vm1, %v381_v37 }
 0x138   : > { %v376_v38 = vpop.f32.mrf.mxu3 }
 0x139   : > { %v377_v39 = vadd.f32 %v582_v28, %v376_v38 }
 0x13b   : > { %v382_v40 = vmax.f32 %v377_v39, 0.0 }
 0x13d   : > { %529 = vmatmul.msk.f32.gmra.mxu2 %vm353_vm1, %v382_v40 }
 0x19c   : > { %v420_v42 = vpop.f32.mrf.mxu1 }
 0x19d   : > { %v421_v43 = vadd.f32 %v583_v41, %v420_v42 }
 0x19f   : > { %v432_v44 = vmax.f32 %v421_v43, 0.0 }
 0x1a1   : > { %v543_v45 = vcvt.f32.s32 %v432_v44  ;;  %v541_v47 = vand.u32 2147483647, %v432_v44  ;;  %v546_v49 = vand.u32 2147483648, %v432_v44 }
 0x1a3   : > { %v544_v46 = vcvt.s32.f32 %v543_v45  ;;  %vm542_vm3 = vcmp.lt.f32.partialorder %v541_v47, 8388608.0 }
 0x1a5   : > { %v545_v48 = vand.u32 2147483647, %v544_v46 }
 0x1a7   : > { %v547_v50 = vor.u32 %v546_v49, %v545_v48 }
 0x1a9   : > { %v548_v51 = vsel %vm542_vm3, %v547_v50, %v432_v44 }
 0x1aa   : > { %441 = vst.msk [vmem:[%s689_s10] sm:$0xff] %vm440_vm2, %v548_v51  ;;  %v423_v52 = vpop.f32.mrf.mxu2 }
 0x1ab   : > { %v424_v53 = vadd.f32 %v583_v41, %v423_v52 }
 0x1ad   : > { %v433_v54 = vmax.f32 %v424_v53, 0.0 }
 0x1af   : > { %v551_v55 = vcvt.f32.s32 %v433_v54  ;;  %v549_v57 = vand.u32 2147483647, %v433_v54  ;;  %v554_v59 = vand.u32 2147483648, %v433_v54 }
 0x1b1   : > { %v552_v56 = vcvt.s32.f32 %v551_v55  ;;  %vm550_vm4 = vcmp.lt.f32.partialorder %v549_v57, 8388608.0 }
 0x1b3   : > { %v553_v58 = vand.u32 2147483647, %v552_v56 }
 0x1b5   : > { %v555_v60 = vor.u32 %v554_v59, %v553_v58 }
 0x1b7   : > { %v556_v61 = vsel %vm550_vm4, %v555_v60, %v433_v54 }
 0x1b8   : > { %442 = vst.msk [vmem:[%s689_s10 + $0x8] sm:$0xff] %vm440_vm2, %v556_v61  ;;  %v426_v62 = vpop.f32.mrf.mxu2 }
 0x1b9   : > { %v427_v63 = vadd.f32 %v583_v41, %v426_v62 }
 0x1bb   : > { %v434_v0 = vmax.f32 %v427_v63, 0.0 }
 0x1bd   : > { %v559_v1 = vcvt.f32.s32 %v434_v0  ;;  %v557_v3 = vand.u32 2147483647, %v434_v0  ;;  %v562_v6 = vand.u32 2147483648, %v434_v0 }
 0x1bf   : > { %v560_v2 = vcvt.s32.f32 %v559_v1  ;;  %vm558_vm5 = vcmp.lt.f32.partialorder %v557_v3, 8388608.0 }
 0x1c0   : > { %v429_v4 = vpop.f32.mrf.mxu2 }
 0x1c1   : > { %v561_v5 = vand.u32 2147483647, %v560_v2  ;;  %v430_v7 = vadd.f32 %v583_v41, %v429_v4 }
 0x1c3   : > { %v563_v8 = vor.u32 %v562_v6, %v561_v5  ;;  %v435_v9 = vmax.f32 %v430_v7, 0.0 }
 0x1c5   : > { %v564_v10 = vsel %vm558_vm5, %v563_v8, %v434_v0  ;;  %v567_v11 = vcvt.f32.s32 %v435_v9  ;;  %v565_v13 = vand.u32 2147483647, %v435_v9  ;;  %v570_v15 = vand.u32 2147483648, %v435_v9 }
 0x1c6   : > { %443 = vst.msk [vmem:[%s689_s10 + $0x10] sm:$0xff] %vm440_vm2, %v564_v10 }
 0x1c7   : > { %v568_v12 = vcvt.s32.f32 %v567_v11  ;;  %vm566_vm6 = vcmp.lt.f32.partialorder %v565_v13, 8388608.0 }
 0x1c9   : > { %v569_v14 = vand.u32 2147483647, %v568_v12 }
 0x1cb   : > { %v571_v16 = vor.u32 %v570_v15, %v569_v14 }
 0x1cd   : > { %v572_v17 = vsel %vm566_vm6, %v571_v16, %v435_v9 }
 0x1ce   : > { %444 = vst.msk [vmem:[%s689_s10 + $0x18] sm:$0xff] %vm440_vm2, %v572_v17 }
 0x1cf PF: > { %s17_s24 = sadd.s32 1, %s590_s24  }
 0x1d0   : > { %p14_p4 = scmp.ge.s32.totalorder %s17_s24, 4  }
 0x1d2   :  { %16 = sbr.rel (!%p14_p4) target bundleno = 1 (0x1), region = 78 }

</bundles_post_ra>
